<compile_context>
chip_gen: v7x
topology: tpu7x:2x2x1
jax: 0.10.0
libtpu: 0.0.40
codegen_flags: <defaults>
</compile_context>

<pallas_src>
import jax
import jax.numpy as jnp
from jax import lax
from jax.experimental import pallas as pl
from jax.experimental.pallas import tpu as pltpu

# TODO(synk): params.supervised_learning.INPUT_FEATURE_SIZE is not available in-script;
# using a small deterministic value consistent with the module's first Linear layer.
INPUT_FEATURE_SIZE = 16
HIDDEN = [64, 128, 64, 32, 1]

_MAX_BATCH_TILE = 8192   # keeps per-step VMEM ~<= 24 MiB on every TPU generation


def _round_up(n, m):
    return ((n + m - 1) // m) * m


def _mlp_kernel(x_ref,            # (bt, F)   f32  — batch on sublanes, features on lanes
                w1_ref, b1_ref,   # (64, F)   bf16, (64, 1)  f32
                w2_ref, b2_ref,   # (128, 64) bf16, (128, 1) f32
                w3_ref, b3_ref,   # (64, 128) bf16, (64, 1)  f32
                w4_ref, b4_ref,   # (32, 64)  bf16, (32, 1)  f32
                w5_ref, b5_ref,   # (32, 1)   f32,  (1, 1)   f32
                o_ref):           # (1, bt)   f32  — lane-dense output row
    """Fused 5-layer MLP forward for one batch tile. All operands are VMEM-resident."""
    x = x_ref[...].astype(jnp.bfloat16)          # cast on the VPU; x stays f32 in HBM

    # Layer 1: fold the [bt, F] -> [F, bt] transpose into the matmul itself by
    # contracting the feature axis of both operands ('of,bf->ob').  Output is (64, bt),
    # i.e. batch lands on the lane axis for all subsequent layers.
    h = lax.dot_general(
        w1_ref[...], x,
        dimension_numbers=(((1,), (1,)), ((), ())),
        preferred_element_type=jnp.float32)                         # (64, bt) f32
    h = jnp.maximum(h + b1_ref[...], 0.0)

    def linear_relu(h, w_ref, b_ref):
        # bf16 MXU operands, f32 accumulate; bias + ReLU in f32 on the VPU.
        y = jnp.dot(w_ref[...], h.astype(jnp.bfloat16),
                    preferred_element_type=jnp.float32) + b_ref[...]
        return jnp.maximum(y, 0.0)

    h = linear_relu(h, w2_ref, b2_ref)   # (128, bt)
    h = linear_relu(h, w3_ref, b3_ref)   # (64,  bt)
    h = linear_relu(h, w4_ref, b4_ref)   # (32,  bt)

    # Final Linear(32, 1) + ReLU as a f32 VPU multiply + sublane (XLU) reduction: keeps
    # the MXU free of an N=1 matmul and directly yields the lane-dense (1, bt) row.
    y = jnp.sum(h * w5_ref[...], axis=0, keepdims=True) + b5_ref[...]   # (1, bt)
    o_ref[...] = jnp.maximum(y, 0.0)


def supervised_network_forward(x, params, *, batch_tile=8192):
    """Forward pass of SupervisedNetwork.

    x:      [B, INPUT_FEATURE_SIZE] float32
    params: list of 5 (W [out, in], b [out]) pairs in PyTorch Linear layout (float32).
    Returns [B, 1] float32.
    """
    B, F = x.shape
    assert F == INPUT_FEATURE_SIZE

    # Pad the batch only to the 128-lane granule (waste <= 127 rows), never to bt.
    B_pad = _round_up(B, 128)
    if B_pad != B:
        x = jnp.pad(x, ((0, B_pad - B), (0, 0)))

    # Tile selection: large tiles amortize the ~0.35us/step pipeline overhead; cap so the
    # footprint fits every generation's VMEM; keep >= 2 grid steps when possible so the
    # "parallel" axis can use both TensorCores on v7x; size the tile to ~evenly divide
    # the (padded) batch so the ragged last block wastes little DMA / MXU work.
    bt_cap = max(128, min(_round_up(batch_tile, 128), _MAX_BATCH_TILE))
    n_steps = pl.cdiv(B_pad, bt_cap)
    if n_steps < 2 and B_pad >= 256:
        n_steps = 2
    bt = _round_up(pl.cdiv(B_pad, n_steps), 128)
    grid = (pl.cdiv(B_pad, bt),)

    (w1, b1), (w2, b2), (w3, b3), (w4, b4), (w5, b5) = params
    flat_args = [
        x,                                                           # (B_pad, F) f32
        w1.astype(jnp.bfloat16), b1.reshape(-1, 1).astype(jnp.float32),
        w2.astype(jnp.bfloat16), b2.reshape(-1, 1).astype(jnp.float32),
        w3.astype(jnp.bfloat16), b3.reshape(-1, 1).astype(jnp.float32),
        w4.astype(jnp.bfloat16), b4.reshape(-1, 1).astype(jnp.float32),
        w5.T.astype(jnp.float32), b5.reshape(1, 1).astype(jnp.float32),  # (32,1), (1,1)
    ]

    in_specs = [pl.BlockSpec((bt, F), lambda i: (i, 0))]
    for a in flat_args[1:]:
        # Constant index maps -> weights/biases stay VMEM-resident across grid steps.
        in_specs.append(pl.BlockSpec(a.shape, lambda i: (0, 0)))

    out_row = pl.pallas_call(
        _mlp_kernel,
        out_shape=jax.ShapeDtypeStruct((1, B_pad), jnp.float32),
        grid=grid,
        in_specs=in_specs,
        out_specs=pl.BlockSpec((1, bt), lambda i: (0, i)),
        compiler_params=pltpu.CompilerParams(
            dimension_semantics=("parallel",),
            vmem_limit_bytes=48 * 1024 * 1024,   # > ~24 MiB footprint at bt=8192,
        ),                                       # < v7x's 64 MiB physical VMEM
    )(*flat_args)

    # Lane-dense (1, B_pad) row -> (B, 1) column.
    return out_row.reshape(B_pad, 1)[:B]


def init_params(key):
    """Deterministic PyTorch-Linear-style init. Returns [(W [out,in], b [out]), ...]."""
    params = []
    dims = [INPUT_FEATURE_SIZE] + HIDDEN
    for fan_in, fan_out in zip(dims[:-1], dims[1:]):
        key, kw, kb = jax.random.split(key, 3)
        bound = float(fan_in) ** -0.5
        w = jax.random.uniform(kw, (fan_out, fan_in), jnp.float32, -bound, bound)
        b = jax.random.uniform(kb, (fan_out,), jnp.float32, -bound, bound)
        params.append((w, b))
    return params


if __name__ == "__main__":
    key = jax.random.PRNGKey(0)
    kx, kp = jax.random.split(key)

    # Odd batch exercises the 128-granule padding, the >=2-step tile split, and the
    # ragged last block (B_pad=384, bt=256, grid=2).
    B = 300
    x = jax.random.normal(kx, (B, INPUT_FEATURE_SIZE), dtype=jnp.float32)
    params = init_params(kp)

    out = supervised_network_forward(x, params)
    jax.block_until_ready(out)

    # Reference in plain JAX with the same precision policy (bf16 MXU operands,
    # f32 accumulate; final layer f32).  PyTorch Linear semantics: y = x @ W^T + b.
    h = x
    for li, (w, b) in enumerate(params):
        if li < 4:
            y = jnp.dot(h.astype(jnp.bfloat16), w.T.astype(jnp.bfloat16),
                        preferred_element_type=jnp.float32) + b
        else:
            y = h @ w.T + b
        h = jnp.maximum(y, 0.0)

    assert out.shape == (B, 1)
    assert jnp.allclose(out, h, atol=1e-3, rtol=1e-3), \
        float(jnp.max(jnp.abs(out - h)))

    print("KERNEL_OK")
</pallas_src>

<mosaic_0001>
module attributes {stable_mosaic.version = 11 : i64} {
  func.func @_mlp_kernel(%arg0: i32, %arg1: memref<256x16xf32, #tpu.memory_space<vmem>>, %arg2: memref<64x16xbf16, #tpu.memory_space<vmem>>, %arg3: memref<64x1xf32, #tpu.memory_space<vmem>>, %arg4: memref<128x64xbf16, #tpu.memory_space<vmem>>, %arg5: memref<128x1xf32, #tpu.memory_space<vmem>>, %arg6: memref<64x128xbf16, #tpu.memory_space<vmem>>, %arg7: memref<64x1xf32, #tpu.memory_space<vmem>>, %arg8: memref<32x64xbf16, #tpu.memory_space<vmem>>, %arg9: memref<32x1xf32, #tpu.memory_space<vmem>>, %arg10: memref<32x1xf32, #tpu.memory_space<vmem>>, %arg11: memref<1x1xf32, #tpu.memory_space<vmem>>, %arg12: memref<1x256xf32, #tpu.memory_space<vmem>>) attributes {dimension_semantics = [#tpu.dimension_semantics<parallel>], iteration_bounds = array<i64: 2>, scalar_prefetch = 0 : i64, scratch_operands = 0 : i64, tpu.core_type = #tpu.core_type<tc>, window_params = [{transform_indices = @transform_0, window_bounds = array<i64: 256, 16>}, {pipeline_mode = #tpu.pipeline_mode<synchronous>, transform_indices = @transform_1, window_bounds = array<i64: 64, 16>}, {pipeline_mode = #tpu.pipeline_mode<synchronous>, transform_indices = @transform_2, window_bounds = array<i64: 64, 1>}, {pipeline_mode = #tpu.pipeline_mode<synchronous>, transform_indices = @transform_3, window_bounds = array<i64: 128, 64>}, {pipeline_mode = #tpu.pipeline_mode<synchronous>, transform_indices = @transform_4, window_bounds = array<i64: 128, 1>}, {pipeline_mode = #tpu.pipeline_mode<synchronous>, transform_indices = @transform_5, window_bounds = array<i64: 64, 128>}, {pipeline_mode = #tpu.pipeline_mode<synchronous>, transform_indices = @transform_6, window_bounds = array<i64: 64, 1>}, {pipeline_mode = #tpu.pipeline_mode<synchronous>, transform_indices = @transform_7, window_bounds = array<i64: 32, 64>}, {pipeline_mode = #tpu.pipeline_mode<synchronous>, transform_indices = @transform_8, window_bounds = array<i64: 32, 1>}, {pipeline_mode = #tpu.pipeline_mode<synchronous>, transform_indices = @transform_9, window_bounds = array<i64: 32, 1>}, {pipeline_mode = #tpu.pipeline_mode<synchronous>, transform_indices = @transform_10, window_bounds = array<i64: 1, 1>}, {transform_indices = @transform_11, window_bounds = array<i64: 1, 256>}]} {
    %c0 = arith.constant 0 : index
    %c0_0 = arith.constant 0 : index
    %0 = vector.load %arg1[%c0, %c0_0] : memref<256x16xf32, #tpu.memory_space<vmem>>, vector<256x16xf32>
    %1 = arith.truncf %0 : vector<256x16xf32> to vector<256x16xbf16>
    %c0_1 = arith.constant 0 : index
    %c0_2 = arith.constant 0 : index
    %2 = vector.load %arg2[%c0_1, %c0_2] : memref<64x16xbf16, #tpu.memory_space<vmem>>, vector<64x16xbf16>
    %cst = arith.constant dense<0.000000e+00> : vector<64x256xf32>
    %3 = tpu.matmul %2, %1, %cst {dimension_numbers = #tpu.dot_dimension_numbers<[1], [1], [0], [0], [0, 0, 1, 0], [], []>} : vector<64x16xbf16>, vector<256x16xbf16>, vector<64x256xf32> -> vector<64x256xf32>
    %c0_3 = arith.constant 0 : index
    %c0_4 = arith.constant 0 : index
    %4 = vector.load %arg3[%c0_3, %c0_4] : memref<64x1xf32, #tpu.memory_space<vmem>>, vector<64x1xf32>
    %5 = vector.broadcast %4 : vector<64x1xf32> to vector<64x256xf32>
    %6 = arith.addf %3, %5 : vector<64x256xf32>
    %cst_5 = arith.constant 0.000000e+00 : f32
    %7 = vector.broadcast %cst_5 : f32 to vector<64x256xf32>
    %8 = arith.maximumf %6, %7 : vector<64x256xf32>
    %c0_6 = arith.constant 0 : index
    %c0_7 = arith.constant 0 : index
    %9 = vector.load %arg4[%c0_6, %c0_7] : memref<128x64xbf16, #tpu.memory_space<vmem>>, vector<128x64xbf16>
    %10 = arith.truncf %8 : vector<64x256xf32> to vector<64x256xbf16>
    %cst_8 = arith.constant dense<0.000000e+00> : vector<128x256xf32>
    %11 = tpu.matmul %9, %10, %cst_8 {dimension_numbers = #tpu.dot_dimension_numbers<[1], [0], [0], [1], [0, 0, 1, 1], [], []>} : vector<128x64xbf16>, vector<64x256xbf16>, vector<128x256xf32> -> vector<128x256xf32>
    %c0_9 = arith.constant 0 : index
    %c0_10 = arith.constant 0 : index
    %12 = vector.load %arg5[%c0_9, %c0_10] : memref<128x1xf32, #tpu.memory_space<vmem>>, vector<128x1xf32>
    %13 = vector.broadcast %12 : vector<128x1xf32> to vector<128x256xf32>
    %14 = arith.addf %11, %13 : vector<128x256xf32>
    %cst_11 = arith.constant 0.000000e+00 : f32
    %15 = vector.broadcast %cst_11 : f32 to vector<128x256xf32>
    %16 = arith.maximumf %14, %15 : vector<128x256xf32>
    %c0_12 = arith.constant 0 : index
    %c0_13 = arith.constant 0 : index
    %17 = vector.load %arg6[%c0_12, %c0_13] : memref<64x128xbf16, #tpu.memory_space<vmem>>, vector<64x128xbf16>
    %18 = arith.truncf %16 : vector<128x256xf32> to vector<128x256xbf16>
    %cst_14 = arith.constant dense<0.000000e+00> : vector<64x256xf32>
    %19 = tpu.matmul %17, %18, %cst_14 {dimension_numbers = #tpu.dot_dimension_numbers<[1], [0], [0], [1], [0, 0, 1, 1], [], []>} : vector<64x128xbf16>, vector<128x256xbf16>, vector<64x256xf32> -> vector<64x256xf32>
    %c0_15 = arith.constant 0 : index
    %c0_16 = arith.constant 0 : index
    %20 = vector.load %arg7[%c0_15, %c0_16] : memref<64x1xf32, #tpu.memory_space<vmem>>, vector<64x1xf32>
    %21 = vector.broadcast %20 : vector<64x1xf32> to vector<64x256xf32>
    %22 = arith.addf %19, %21 : vector<64x256xf32>
    %cst_17 = arith.constant 0.000000e+00 : f32
    %23 = vector.broadcast %cst_17 : f32 to vector<64x256xf32>
    %24 = arith.maximumf %22, %23 : vector<64x256xf32>
    %c0_18 = arith.constant 0 : index
    %c0_19 = arith.constant 0 : index
    %25 = vector.load %arg8[%c0_18, %c0_19] : memref<32x64xbf16, #tpu.memory_space<vmem>>, vector<32x64xbf16>
    %26 = arith.truncf %24 : vector<64x256xf32> to vector<64x256xbf16>
    %cst_20 = arith.constant dense<0.000000e+00> : vector<32x256xf32>
    %27 = tpu.matmul %25, %26, %cst_20 {dimension_numbers = #tpu.dot_dimension_numbers<[1], [0], [0], [1], [0, 0, 1, 1], [], []>} : vector<32x64xbf16>, vector<64x256xbf16>, vector<32x256xf32> -> vector<32x256xf32>
    %c0_21 = arith.constant 0 : index
    %c0_22 = arith.constant 0 : index
    %28 = vector.load %arg9[%c0_21, %c0_22] : memref<32x1xf32, #tpu.memory_space<vmem>>, vector<32x1xf32>
    %29 = vector.broadcast %28 : vector<32x1xf32> to vector<32x256xf32>
    %30 = arith.addf %27, %29 : vector<32x256xf32>
    %cst_23 = arith.constant 0.000000e+00 : f32
    %31 = vector.broadcast %cst_23 : f32 to vector<32x256xf32>
    %32 = arith.maximumf %30, %31 : vector<32x256xf32>
    %c0_24 = arith.constant 0 : index
    %c0_25 = arith.constant 0 : index
    %33 = vector.load %arg10[%c0_24, %c0_25] : memref<32x1xf32, #tpu.memory_space<vmem>>, vector<32x1xf32>
    %34 = vector.broadcast %33 : vector<32x1xf32> to vector<32x256xf32>
    %35 = arith.mulf %32, %34 : vector<32x256xf32>
    %cst_26 = arith.constant dense<0.000000e+00> : vector<256xf32>
    %36 = vector.multi_reduction <add>, %35, %cst_26 [0] : vector<32x256xf32> to vector<256xf32>
    %37 = vector.shape_cast %36 : vector<256xf32> to vector<1x256xf32>
    %c0_27 = arith.constant 0 : index
    %c0_28 = arith.constant 0 : index
    %38 = vector.load %arg11[%c0_27, %c0_28] : memref<1x1xf32, #tpu.memory_space<vmem>>, vector<1x1xf32>
    %39 = vector.broadcast %38 : vector<1x1xf32> to vector<1x256xf32>
    %40 = arith.addf %37, %39 : vector<1x256xf32>
    %cst_29 = arith.constant 0.000000e+00 : f32
    %41 = vector.broadcast %cst_29 : f32 to vector<1x256xf32>
    %42 = arith.maximumf %40, %41 : vector<1x256xf32>
    %c0_30 = arith.constant 0 : index
    %c0_31 = arith.constant 0 : index
    %43 = vector.load %arg12[%c0_30, %c0_31] : memref<1x256xf32, #tpu.memory_space<vmem>>, vector<1x256xf32>
    tpu.vector_store %arg12[%c0_30, %c0_31], %42 {strides = array<i32>} : memref<1x256xf32, #tpu.memory_space<vmem>>, vector<1x256xf32>,
    return
  }
  func.func @transform_0(%arg0: i32) -> (i32, i32) {
    %c0_i32 = arith.constant 0 : i32
    %c0_i32_0 = arith.constant 0 : i32
    return %arg0, %c0_i32 : i32, i32
  }
  func.func @transform_1(%arg0: i32) -> (i32, i32) {
    %c0_i32 = arith.constant 0 : i32
    %c0_i32_0 = arith.constant 0 : i32
    %c0_i32_1 = arith.constant 0 : i32
    return %c0_i32, %c0_i32_0 : i32, i32
  }
  func.func @transform_2(%arg0: i32) -> (i32, i32) {
    %c0_i32 = arith.constant 0 : i32
    %c0_i32_0 = arith.constant 0 : i32
    %c0_i32_1 = arith.constant 0 : i32
    return %c0_i32, %c0_i32_0 : i32, i32
  }
  func.func @transform_3(%arg0: i32) -> (i32, i32) {
    %c0_i32 = arith.constant 0 : i32
    %c0_i32_0 = arith.constant 0 : i32
    %c0_i32_1 = arith.constant 0 : i32
    return %c0_i32, %c0_i32_0 : i32, i32
  }
  func.func @transform_4(%arg0: i32) -> (i32, i32) {
    %c0_i32 = arith.constant 0 : i32
    %c0_i32_0 = arith.constant 0 : i32
    %c0_i32_1 = arith.constant 0 : i32
    return %c0_i32, %c0_i32_0 : i32, i32
  }
  func.func @transform_5(%arg0: i32) -> (i32, i32) {
    %c0_i32 = arith.constant 0 : i32
    %c0_i32_0 = arith.constant 0 : i32
    %c0_i32_1 = arith.constant 0 : i32
    return %c0_i32, %c0_i32_0 : i32, i32
  }
  func.func @transform_6(%arg0: i32) -> (i32, i32) {
    %c0_i32 = arith.constant 0 : i32
    %c0_i32_0 = arith.constant 0 : i32
    %c0_i32_1 = arith.constant 0 : i32
    return %c0_i32, %c0_i32_0 : i32, i32
  }
  func.func @transform_7(%arg0: i32) -> (i32, i32) {
    %c0_i32 = arith.constant 0 : i32
    %c0_i32_0 = arith.constant 0 : i32
    %c0_i32_1 = arith.constant 0 : i32
    return %c0_i32, %c0_i32_0 : i32, i32
  }
  func.func @transform_8(%arg0: i32) -> (i32, i32) {
    %c0_i32 = arith.constant 0 : i32
    %c0_i32_0 = arith.constant 0 : i32
    %c0_i32_1 = arith.constant 0 : i32
    return %c0_i32, %c0_i32_0 : i32, i32
  }
  func.func @transform_9(%arg0: i32) -> (i32, i32) {
    %c0_i32 = arith.constant 0 : i32
    %c0_i32_0 = arith.constant 0 : i32
    %c0_i32_1 = arith.constant 0 : i32
    return %c0_i32, %c0_i32_0 : i32, i32
  }
  func.func @transform_10(%arg0: i32) -> (i32, i32) {
    %c0_i32 = arith.constant 0 : i32
    %c0_i32_0 = arith.constant 0 : i32
    %c0_i32_1 = arith.constant 0 : i32
    return %c0_i32, %c0_i32_0 : i32, i32
  }
  func.func @transform_11(%arg0: i32) -> (i32, i32) {
    %c0_i32 = arith.constant 0 : i32
    %c0_i32_0 = arith.constant 0 : i32
    return %c0_i32, %arg0 : i32, i32
  }
}

</mosaic_0001>

<bundles_post_ra>
// kernel: tpu_custom_call.1
= control target key start
LH: loop header
LB: loop body
LE: loop exit
PB: predicated region body
PF: predicated region fallthrough
CT: control target
= control target key end

     0   :  { %s2129_s0 = inlined_call_operand.vmem [shape: f32[384,16], index: 0, kind: input, shape index: {}]   ;;  %s2130_s1 = inlined_call_operand.vmem [shape: bf16[64,16], index: 1, kind: input, shape index: {}]   ;;  %s2131_s2 = inlined_call_operand.vmem [shape: f32[64,1], index: 2, kind: input, shape index: {}]   ;;  %s2132_s3 = inlined_call_operand.vmem [shape: bf16[128,64], index: 3, kind: input, shape index: {}]   ;;  %s2133_s4 = inlined_call_operand.vmem [shape: f32[128,1], index: 4, kind: input, shape index: {}]   ;;  %s2134_s5 = inlined_call_operand.vmem [shape: bf16[64,128], index: 5, kind: input, shape index: {}]   ;;  %s2135_s6 = inlined_call_operand.vmem [shape: f32[64,1], index: 6, kind: input, shape index: {}]   ;;  %s2136_s7 = inlined_call_operand.vmem [shape: bf16[32,64], index: 7, kind: input, shape index: {}]   ;;  %s2137_s8 = inlined_call_operand.vmem [shape: f32[32,1], index: 8, kind: input, shape index: {}]   ;;  %s2138_s9 = inlined_call_operand.vmem [shape: f32[32,1], index: 9, kind: input, shape index: {}]   ;;  %s2139_s10 = inlined_call_operand.<no memory space> [shape: f32[1,1], index: 10, kind: input, shape index: {}]   ;;  %s2140_s11 = inlined_call_operand.hbm [shape: f32[1,384], index: 11, kind: output, shape index: {}]  }
   0x1   :  { %v16_v0 = vstv %s2139_s10 }
   0x2   :  { %17 = vst [vmem:[#allocation2] sm:$0x1] %v16_v0 }
   0x3   :  { %18 = vsyncpa [#allocation4], 0 }
   0x4   :  { %20 = vsyncpa [#allocation4 + $0x1], 0  ;;  %s1752_s19 = smov 0   ;;  %s1754_s20 = smov 0  }
   0x5   :  { %s1756_s21 = smov 0   ;;  %s1758_s22 = smov 0  }
   0x6 LB: > { %s1773_s10 = sadd.s32 4294967295, %s1684_s22   ;;  %s1483_s23 = sadd.s32 4294967294, %s1684_s22   ;;  %s1684_s22 = sphi %s1758_s22, %s2148_s22   ;;  %s1680_s21 = sphi %s1756_s21, %s2147_s21   ;;  %s1676_s20 = sphi %s1754_s20, %s2146_s20   ;;  %s1672_s19 = sphi %s1752_s19, %s2145_s19  }
   0x7   : > { %s1777_s24 = sadd.s32 1, %s1684_s22   ;;  %s269_s25 = sadd.s32 1, %s1680_s21 }
   0x8   : > { %s266_s26 = ssub.s32 %s1684_s22, %s1777_s24  ;;  %p279_p0 = scmp.ne.s32.totalorder %s1680_s21, %s1676_s20 }
   0x9   : > { %p267_p1 = scmp.eq.s32.totalorder %s266_s26, 0  ;;  %p280_p2 = scmp.eq.s32.totalorder %s1773_s10, 1 }
   0xa   : > { %p285_p3 = scmp.ne.s32.totalorder %s1676_s20, %s1672_s19  ;;  %p286_p4 = scmp.eq.s32.totalorder %s1483_s23, 1 }
   0xb   : > { %s1788_s27 = scalar_select %p267_p1, %s1680_s21, %s269_s25  }
   0xc   : > { %p1790_p5 = por %p280_p2, %p279_p0  ;;  %p1794_p6 = por %p286_p4, %p285_p3 }
   0xd   : > { %2141 = sst [smem:[#allocation6_spill]] %s1788_s27  ;;  %p1486_p7 = scmp.ge.s32.totalorder %s1684_s22, 1 }
   0xe   : > { %p351_p8 = scmp.lt.s32.totalorder %s1684_s22, 3 }
  0x10   : > { %p352_p9 = pnand %p1486_p7, %p351_p8 }
  0x11   : > { %s1801_s30 = sshll.u32 (!%p352_p9), %s1773_s10, 5  ;;  %v1807_v1 = vld [vmem:[%s2130_s1] sm:$0xff] (!%p352_p9)   ;;  %vm539_vm0 = vcmask (!%p352_p9), 130048   ;;  %v1686_v3 = vmov (!%p352_p9), 0   ;;  %v473_v4 = vld [vmem:[%s2131_s2 + $0x10] sm:$0xff] (!%p352_p9)  ;;  %v472_v5 = vld [vmem:[%s2131_s2 + $0x8] sm:$0xff] (!%p352_p9) }
  0x12   : > { %355 = sbr.rel (%p352_p9) target bundleno = 1157 (0x485), region = 64  ;;  %p400_p10 = scmp.lt.s32.totalorder (!%p352_p9), %s1801_s30, 47  ;;  %v471_v2 = vld [vmem:[%s2131_s2] sm:$0xff] (!%p352_p9)  ;;  %1546 = vmatprep.mubr.msk.bf16.mxu0 (!%p352_p9), %vm539_vm0, %v1807_v1  ;;  %1602 = vset.pattern.permute.xlu0 (!%p352_p9), %v1686_v3  ;;  %v474_v6 = vld [vmem:[%s2131_s2 + $0x18] sm:$0xff] (!%p352_p9)  ;;  %v476_v19 = vld [vmem:[%s2131_s2 + $0x28] sm:$0xff] (!%p352_p9)  ;;  %vm849_vm1 = vcmask (!%p352_p9), 523264  }
  0x13   : > { %481 = vperm.xlu0 (!%p352_p9), %1602, %v471_v2   ;;  %1603 = vset.pattern.permute.xlu1 (!%p352_p9), %v1686_v3  ;;  %v475_v16 = vld [vmem:[%s2131_s2 + $0x20] sm:$0xff] (!%p352_p9)  ;;  %v477_v22 = vld [vmem:[%s2131_s2 + $0x30] sm:$0xff] (!%p352_p9)  ;;  %v478_v28 = vld [vmem:[%s2131_s2 + $0x38] sm:$0xff] (!%p352_p9) }
  0x14   : > { %491 = vperm.xlu1 (!%p352_p9), %1603, %v473_v4   ;;  %906 = vmatprep.mubr.bf16.mxu1 (!%p352_p9), %v1686_v3  ;;  %v713_v27 = vld [vmem:[%s2133_s4] sm:$0xff] (!%p352_p9)  ;;  %v714_v31 = vld [vmem:[%s2133_s4 + $0x8] sm:$0xff] (!%p352_p9)  ;;  %v715_v35 = vld [vmem:[%s2133_s4 + $0x10] sm:$0xff] (!%p352_p9) }
  0x15   : > { %v716_v38 = vld [vmem:[%s2133_s4 + $0x18] sm:$0xff] (!%p352_p9)  ;;  %v717_v42 = vld [vmem:[%s2133_s4 + $0x20] sm:$0xff] (!%p352_p9)  ;;  %v718_v43 = vld [vmem:[%s2133_s4 + $0x28] sm:$0xff] (!%p352_p9) }
  0x16   : > { %v719_v47 = vld [vmem:[%s2133_s4 + $0x30] sm:$0xff] (!%p352_p9)  ;;  %v720_v48 = vld [vmem:[%s2133_s4 + $0x38] sm:$0xff] (!%p352_p9)  ;;  %v721_v49 = vld [vmem:[%s2133_s4 + $0x40] sm:$0xff] (!%p352_p9) }
  0x17   : > { %486 = vperm.xlu0 (!%p352_p9), %1602, %v472_v5   ;;  %v722_v53 = vld [vmem:[%s2133_s4 + $0x48] sm:$0xff] (!%p352_p9)  ;;  %v723_v54 = vld [vmem:[%s2133_s4 + $0x50] sm:$0xff] (!%p352_p9)  ;;  %v724_v58 = vld [vmem:[%s2133_s4 + $0x58] sm:$0xff] (!%p352_p9) }
  0x18   : > { %496 = vperm.xlu1 (!%p352_p9), %1603, %v474_v6   ;;  %v725_v61 = vld [vmem:[%s2133_s4 + $0x60] sm:$0xff] (!%p352_p9)  ;;  %v726_v0 = vld [vmem:[%s2133_s4 + $0x68] sm:$0xff] (!%p352_p9)  ;;  %v727_v4 = vld [vmem:[%s2133_s4 + $0x70] sm:$0xff] (!%p352_p9) }
  0x19   : > { %s401_s16 = scalar_select %p400_p10, %s1801_s30, 47 }
  0x1a   : > { %s1523_s25 = sshll.u32 (%p1790_p5), %s1773_s10, 1 }
  0x1b   : > { %s1489_s23 = sshll.u32 %s401_s16, 3  ;;  %501 = vperm.xlu0 %1602, %v475_v16   ;;  %s392_s16 = sand.u32 1, %s1676_s20  }
  0x1c   : > { %s1827_s14 = scalar_lea.vmem %s2129_s0, %s1489_s23  ;;  %506 = vperm.xlu1 %1603, %v476_v19   ;;  %s1487_s17 = sshll.u32 %s392_s16, 1 }
  0x1d   : > { %v431_v7 = vld [vmem:[%s1827_s14 + $0x80] sm:$0xff]  ;;  %v432_v8 = vld [vmem:[%s1827_s14 + $0x88] sm:$0xff]  ;;  %v433_v12 = vld [vmem:[%s1827_s14 + $0x90] sm:$0xff]  ;;  %s394_s18 = scalar_lea.vmem [#allocation3], %s1487_s17  ;;  %s2075_s23 = scalar_lea.sflag [#allocation4], %s392_s16 }
  0x1e   : > { %v415_v9 = vld [vmem:[%s1827_s14] sm:$0xff]  ;;  %v455_v10 = vpack.c.bf16 %v432_v8, %v431_v7  ;;  %v416_v11 = vld [vmem:[%s1827_s14 + $0x8] sm:$0xff]  ;;  %v434_v13 = vld [vmem:[%s1827_s14 + $0x98] sm:$0xff] }
  0x1f   : > { %v447_v14 = vpack.c.bf16 %v416_v11, %v415_v9  ;;  %v456_v15 = vpack.c.bf16 %v434_v13, %v433_v12  ;;  %v417_v17 = vld [vmem:[%s1827_s14 + $0x10] sm:$0xff]  ;;  %v418_v18 = vld [vmem:[%s1827_s14 + $0x18] sm:$0xff]  ;;  %v435_v23 = vld [vmem:[%s1827_s14 + $0xa0] sm:$0xff]  ;;  %511 = vperm.xlu0 %1602, %v477_v22  }
  0x20   : > { %1554 = vmatprep.subr.msk.bf16.mxu0 %vm539_vm0, %v455_v10  ;;  %v448_v21 = vpack.c.bf16 %v418_v18, %v417_v17  ;;  %v436_v24 = vld [vmem:[%s1827_s14 + $0xa8] sm:$0xff]  ;;  %v419_v29 = vld [vmem:[%s1827_s14 + $0x20] sm:$0xff]  ;;  %516 = vperm.xlu1 %1603, %v478_v28   ;;  %v421_v33 = vld [vmem:[%s1827_s14 + $0x30] sm:$0xff] }
  0x21   : > { %v553_v20 = vsel %vm539_vm0, %v447_v14, 0  ;;  %v457_v26 = vpack.c.bf16 %v436_v24, %v435_v23  ;;  %v420_v30 = vld [vmem:[%s1827_s14 + $0x28] sm:$0xff]  ;;  %v422_v34 = vld [vmem:[%s1827_s14 + $0x38] sm:$0xff]  ;;  %v437_v36 = vld [vmem:[%s1827_s14 + $0xb0] sm:$0xff] }
  0x22   : > { %1531 = vmatpush3.bf16.xpose.msra.mxu0 %v553_v20  ;;  %v556_v25 = vsel %vm539_vm0, %v448_v21, 0  ;;  %v449_v32 = vpack.c.bf16 %v420_v30, %v419_v29  ;;  %v438_v37 = vld [vmem:[%s1827_s14 + $0xb8] sm:$0xff]  ;;  %v450_v39 = vpack.c.bf16 %v422_v34, %v421_v33  ;;  %v439_v45 = vld [vmem:[%s1827_s14 + $0xc0] sm:$0xff]  ;;  %v440_v46 = vld [vmem:[%s1827_s14 + $0xc8] sm:$0xff] }
  0x23   : > { %1555 = vmatprep.subr.msk.bf16.mxu0 %vm539_vm0, %v456_v15  ;;  %731 = vperm.xlu0 %1602, %v713_v27   ;;  %v458_v41 = vpack.c.bf16 %v438_v37, %v437_v36  ;;  %v423_v50 = vld [vmem:[%s1827_s14 + $0x40] sm:$0xff]  ;;  %v424_v51 = vld [vmem:[%s1827_s14 + $0x48] sm:$0xff]  ;;  %v459_v52 = vpack.c.bf16 %v440_v46, %v439_v45  ;;  %v441_v56 = vld [vmem:[%s1827_s14 + $0xd0] sm:$0xff] }
  0x24   : > { %736 = vperm.xlu1 %1603, %v714_v31   ;;  %v559_v40 = vsel %vm539_vm0, %v449_v32, 0  ;;  %v562_v44 = vsel %vm539_vm0, %v450_v39, 0  ;;  %v451_v55 = vpack.c.bf16 %v424_v51, %v423_v50  ;;  %v442_v57 = vld [vmem:[%s1827_s14 + $0xd8] sm:$0xff]  ;;  %v425_v62 = vld [vmem:[%s1827_s14 + $0x50] sm:$0xff]  ;;  %v443_v5 = vld [vmem:[%s1827_s14 + $0xe0] sm:$0xff] }
  0x25   : > { %v460_v60 = vpack.c.bf16 %v442_v57, %v441_v56  ;;  %v426_v63 = vld [vmem:[%s1827_s14 + $0x58] sm:$0xff]  ;;  %v444_v6 = vld [vmem:[%s1827_s14 + $0xe8] sm:$0xff]  ;;  %v1043_v10 = vld [vmem:[%s2135_s6] sm:$0xff] }
  0x26   : > { %v565_v59 = vsel %vm539_vm0, %v451_v55, 0  ;;  %v452_v2 = vpack.c.bf16 %v426_v63, %v425_v62  ;;  %v728_v7 = vld [vmem:[%s2133_s4 + $0x78] sm:$0xff]  ;;  %v461_v9 = vpack.c.bf16 %v444_v6, %v443_v5  ;;  %v427_v11 = vld [vmem:[%s1827_s14 + $0x60] sm:$0xff]  ;;  %v428_v12 = vld [vmem:[%s1827_s14 + $0x68] sm:$0xff] }
  0x27   : > { %741 = vperm.xlu0 %1602, %v715_v35   ;;  %v1044_v13 = vld [vmem:[%s2135_s6 + $0x8] sm:$0xff]  ;;  %v453_v14 = vpack.c.bf16 %v428_v12, %v427_v11  ;;  %v1045_v15 = vld [vmem:[%s2135_s6 + $0x10] sm:$0xff]  ;;  %v446_v17 = vld [vmem:[%s1827_s14 + $0xf8] sm:$0xff] }
  0x28   : > { %746 = vperm.xlu1 %1603, %v716_v38   ;;  %v568_v8 = vsel %vm539_vm0, %v452_v2, 0  ;;  %v445_v16 = vld [vmem:[%s1827_s14 + $0xf0] sm:$0xff]  ;;  %v1046_v18 = vld [vmem:[%s2135_s6 + $0x18] sm:$0xff]  ;;  %v1047_v21 = vld [vmem:[%s2135_s6 + $0x20] sm:$0xff] }
  0x29   : > { %v571_v19 = vsel %vm539_vm0, %v453_v14, 0  ;;  %v462_v20 = vpack.c.bf16 %v446_v17, %v445_v16  ;;  %v429_v22 = vld [vmem:[%s1827_s14 + $0x70] sm:$0xff]  ;;  %v430_v23 = vld [vmem:[%s1827_s14 + $0x78] sm:$0xff]  ;;  %v1048_v24 = vld [vmem:[%s2135_s6 + $0x28] sm:$0xff]  ;;  %s1413_s14 = ssub.s32 (%p1790_p5), 3, %s1523_s25 }
  0x2a   : > { %1533 = vmatpush3.bf16.xpose.msra.mxu0 %v556_v25  ;;  %v454_v25 = vpack.c.bf16 %v430_v23, %v429_v22  ;;  %v1050_v27 = vld [vmem:[%s2135_s6 + $0x38] sm:$0xff]  ;;  %v1216_v29 = vld [vmem:[%s2137_s8] sm:$0xff]  ;;  %v1217_v30 = vld [vmem:[%s2137_s8 + $0x8] sm:$0xff]  ;;  %p1414_p11 = scmp.lt.s32.totalorder (%p1790_p5), %s1413_s14, 2 }
  0x2b   : > { %1556 = vmatprep.subr.msk.bf16.mxu0 %vm539_vm0, %v457_v26  ;;  %751 = vperm.xlu0 %1602, %v717_v42   ;;  %v1049_v26 = vld [vmem:[%s2135_s6 + $0x30] sm:$0xff]  ;;  %v1219_v32 = vld [vmem:[%s2137_s8 + $0x18] sm:$0xff]  ;;  %v1605_v33 = vld [vmem:[%s2130_s1 + $0x8] sm:$0xff]  }
  0x2c   : > { %756 = vperm.xlu1 %1603, %v718_v43   ;;  %v574_v28 = vsel %vm539_vm0, %v454_v25, 0  ;;  %v1218_v31 = vld [vmem:[%s2137_s8 + $0x10] sm:$0xff]  ;;  %v1317_v34 = vld [vmem:[%s2138_s9] sm:$0xff]  ;;  %v1318_v35 = vld [vmem:[%s2138_s9 + $0x8] sm:$0xff] }
  0x2d   : > { %v1319_v36 = vld [vmem:[%s2138_s9 + $0x10] sm:$0xff]  ;;  %v1320_v37 = vld [vmem:[%s2138_s9 + $0x18] sm:$0xff]  ;;  %v1367_v38 = vld [vmem:[#allocation2] sm:$0x1] }
  0x2e   : > { %v1607_v39 = vld [vmem:[%s2130_s1 + $0x18] sm:$0xff]  }
  0x2f   : > { %761 = vperm.xlu0 %1602, %v719_v47  }
  0x30   : > { %766 = vperm.xlu1 %1603, %v720_v48  }
  0x32   : > { %1535 = vmatpush3.bf16.xpose.msra.mxu0 %v559_v40 }
  0x33   : > { %1557 = vmatprep.subr.msk.bf16.mxu0 %vm539_vm0, %v458_v41  ;;  %771 = vperm.xlu0 %1602, %v721_v49  }
  0x34   : > { %776 = vperm.xlu1 %1603, %v722_v53  }
  0x37   : > { %781 = vperm.xlu0 %1602, %v723_v54  }
  0x38   : > { %786 = vperm.xlu1 %1603, %v724_v58  }
  0x3a   : > { %1537 = vmatpush3.bf16.xpose.msra.mxu0 %v562_v44 }
  0x3b   : > { %1558 = vmatprep.subr.msk.bf16.mxu0 %vm539_vm0, %v459_v52  ;;  %791 = vperm.xlu0 %1602, %v725_v61  }
  0x3c   : > { %796 = vperm.xlu1 %1603, %v726_v0  }
  0x3f   : > { %801 = vperm.xlu0 %1602, %v727_v4  }
  0x40   : > { %806 = vperm.xlu1 %1603, %v728_v7  }
  0x42   : > { %1539 = vmatpush3.bf16.xpose.msra.mxu0 %v565_v59 }
  0x43   : > { %1559 = vmatprep.subr.msk.bf16.mxu0 %vm539_vm0, %v460_v60  ;;  %1053 = vperm.xlu0 %1602, %v1043_v10  }
  0x44   : > { %1058 = vperm.xlu1 %1603, %v1044_v13  }
  0x47   : > { %1063 = vperm.xlu0 %1602, %v1045_v15  }
  0x48   : > { %1068 = vperm.xlu1 %1603, %v1046_v18  }
  0x4a   : > { %1541 = vmatpush3.bf16.xpose.msra.mxu0 %v568_v8 }
  0x4b   : > { %1560 = vmatprep.subr.msk.bf16.mxu0 %vm539_vm0, %v461_v9  ;;  %1073 = vperm.xlu0 %1602, %v1047_v21  }
  0x4c   : > { %1078 = vperm.xlu1 %1603, %v1048_v24  }
  0x4f   : > { %1083 = vperm.xlu0 %1602, %v1049_v26  }
  0x50   : > { %1088 = vperm.xlu1 %1603, %v1050_v27  }
  0x52   : > { %1543 = vmatpush3.bf16.xpose.msra.mxu0 %v571_v19 }
  0x53   : > { %1561 = vmatprep.subr.msk.bf16.mxu0 %vm539_vm0, %v462_v20  ;;  %1222 = vperm.xlu0 %1602, %v1216_v29  }
  0x54   : > { %1227 = vperm.xlu1 %1603, %v1217_v30  }
  0x57   : > { %1232 = vperm.xlu0 %1602, %v1218_v31  }
  0x58   : > { %1237 = vperm.xlu1 %1603, %v1219_v32  }
  0x5a   : > { %1545 = vmatpush3.bf16.xpose.msra.mxu0 %v574_v28 }
  0x5b   : > { %1323 = vperm.xlu0 %1602, %v1317_v34  }
  0x5c   : > { %1328 = vperm.xlu1 %1603, %v1318_v35  }
  0x5f   : > { %1333 = vperm.xlu0 %1602, %v1319_v36  }
  0x60   : > { %1338 = vperm.xlu1 %1603, %v1320_v37  }
  0x61   : > { %1547 = vmatmul.mubr.msk.bf16.vlgmr.msra.gmra.mrb[0].mxu0 %vm539_vm0, %v1807_v1  ;;  %v1606_v1 = vld [vmem:[%s2130_s1 + $0x10] sm:$0xff]  }
  0x62   : > { %1548 = vmatprep.mubr.msk.bf16.mxu0 %vm539_vm0, %v1605_v33 }
  0x63   : > { %1370 = vperm.xlu0 %1602, %v1367_v38  }
  0x69   : > { %1549 = vmatmul.mubr.msk.bf16.gmra.mrb[4].mxu0 %vm539_vm0, %v1605_v33 }
  0x6a   : > { %1550 = vmatprep.mubr.msk.bf16.mxu0 %vm539_vm0, %v1606_v1 }
  0x71   : > { %1551 = vmatmul.mubr.msk.bf16.gmra.mrb[8].mxu0 %vm539_vm0, %v1606_v1 }
  0x72   : > { %1552 = vmatprep.mubr.msk.bf16.mxu0 %vm539_vm0, %v1607_v39 }
  0x79   : > { %1553 = vmatmul.mubr.msk.bf16.gmra.mrb[12].mxu0 %vm539_vm0, %v1607_v39 }
  0x7a   : > { %1288 = vmatprep.mubr.bf16.mxu0 %v1686_v3 }
  0x92   : > { %v482_v40 = vpop.permute.xlu0 %481 }
  0x93   : > { %v492_v49 = vpop.permute.xlu1 %491 }
  0x96   : > { %v487_v44 = vpop.permute.xlu0 %486 }
  0x97   : > { %v497_v60 = vpop.permute.xlu1 %496 }
  0x9a   : > { %v502_v9 = vpop.permute.xlu0 %501 }
  0x9b   : > { %v507_v14 = vpop.permute.xlu1 %506 }
  0x9e   : > { %v512_v25 = vpop.permute.xlu0 %511 }
  0x9f   : > { %v517_v30 = vpop.permute.xlu1 %516 }
 0x134   : > { %v634_v41 = vpop.f32.mrb[0].mxu0 }
 0x135   : > { %v635_v42 = vadd.f32 %v634_v41, %v482_v40  ;;  %v636_v43 = vpop.f32.mrb[1].mxu0  ;;  %v1608_v41 = vld [vmem:[%s2132_s3] sm:$0xff]  }
 0x136   : > { %v637_v45 = vadd.f32 %v636_v43, %v482_v40  ;;  %v638_v46 = vpop.f32.mrb[2].mxu0  ;;  %v1610_v43 = vld [vmem:[%s2132_s3 + $0x10] sm:$0xff]  }
 0x137   : > { %v639_v47 = vadd.f32 %v638_v46, %v487_v44  ;;  %v640_v48 = vpop.f32.mrb[3].mxu0  ;;  %v673_v51 = vmax.f32 %v635_v42, 0.0  ;;  %v1609_v42 = vld [vmem:[%s2132_s3 + $0x8] sm:$0xff]  }
 0x138   : > { %v641_v50 = vadd.f32 %v640_v48, %v487_v44  ;;  %v674_v53 = vmax.f32 %v637_v45, 0.0  ;;  %v1611_v44 = vld [vmem:[%s2132_s3 + $0x18] sm:$0xff]   ;;  %v1612_v45 = vld [vmem:[%s2132_s3 + $0x20] sm:$0xff]   ;;  %v1613_v46 = vld [vmem:[%s2132_s3 + $0x28] sm:$0xff]  }
 0x139   : > { %v675_v52 = vmax.f32 %v639_v47, 0.0  ;;  %v1614_v47 = vld [vmem:[%s2132_s3 + $0x30] sm:$0xff]   ;;  %v1615_v48 = vld [vmem:[%s2132_s3 + $0x38] sm:$0xff]  }
 0x13a   : > { %v676_v54 = vmax.f32 %v641_v50, 0.0 }
 0x13b   : > { %v705_v55 = vpack.c.bf16 %v675_v52, %v673_v51 }
 0x13c   : > { %v644_v56 = vpop.f32.mrb[4].mxu0  ;;  %v706_v57 = vpack.c.bf16 %v676_v54, %v674_v53  ;;  %v737_v53 = vpop.permute.xlu1 %736 }
 0x13d   : > { %v645_v58 = vadd.f32 %v644_v56, %v492_v49  ;;  %v646_v59 = vpop.f32.mrb[5].mxu0 }
 0x13e   : > { %v647_v61 = vadd.f32 %v646_v59, %v492_v49  ;;  %v648_v62 = vpop.f32.mrb[6].mxu0  ;;  %874 = vmatprep.subr.bf16.mxu1 %v706_v57  ;;  %v732_v49 = vpop.permute.xlu0 %731 }
 0x13f   : > { %v649_v63 = vadd.f32 %v648_v62, %v497_v60  ;;  %v650_v0 = vpop.f32.mrb[7].mxu0  ;;  %875 = vmatpush1.bf16.msra.mxu1 %v705_v55  ;;  %v677_v4 = vmax.f32 %v645_v58, 0.0 }
 0x140   : > { %v651_v2 = vadd.f32 %v650_v0, %v497_v60  ;;  %v678_v6 = vmax.f32 %v647_v61, 0.0 }
 0x141   : > { %v679_v5 = vmax.f32 %v649_v63, 0.0 }
 0x142   : > { %v680_v7 = vmax.f32 %v651_v2, 0.0  ;;  %v742_v0 = vpop.permute.xlu0 %741 }
 0x143   : > { %v707_v8 = vpack.c.bf16 %v679_v5, %v677_v4 }
 0x144   : > { %v708_v10 = vpack.c.bf16 %v680_v7, %v678_v6  ;;  %v654_v11 = vpop.f32.mrb[8].mxu0  ;;  %v747_v7 = vpop.permute.xlu1 %746 }
 0x145   : > { %v655_v12 = vadd.f32 %v654_v11, %v502_v9  ;;  %v656_v13 = vpop.f32.mrb[9].mxu0 }
 0x146   : > { %v657_v15 = vadd.f32 %v656_v13, %v502_v9  ;;  %v658_v16 = vpop.f32.mrb[10].mxu0  ;;  %876 = vmatprep.subr.bf16.mxu1 %v708_v10 }
 0x147   : > { %v659_v17 = vadd.f32 %v658_v16, %v507_v14  ;;  %v660_v18 = vpop.f32.mrb[11].mxu0  ;;  %877 = vmatpush1.bf16.msra.mxu1 %v707_v8  ;;  %v681_v20 = vmax.f32 %v655_v12, 0.0 }
 0x148   : > { %v661_v19 = vadd.f32 %v660_v18, %v507_v14  ;;  %v682_v22 = vmax.f32 %v657_v15, 0.0  ;;  %v752_v18 = vpop.permute.xlu0 %751 }
 0x149   : > { %v683_v21 = vmax.f32 %v659_v17, 0.0 }
 0x14a   : > { %v684_v23 = vmax.f32 %v661_v19, 0.0 }
 0x14b   : > { %v709_v24 = vpack.c.bf16 %v683_v21, %v681_v20 }
 0x14c   : > { %v710_v26 = vpack.c.bf16 %v684_v23, %v682_v22  ;;  %v664_v27 = vpop.f32.mrb[12].mxu0  ;;  %v757_v23 = vpop.permute.xlu1 %756 }
 0x14d   : > { %v665_v28 = vadd.f32 %v664_v27, %v512_v25  ;;  %v666_v29 = vpop.f32.mrb[13].mxu0 }
 0x14e   : > { %v667_v31 = vadd.f32 %v666_v29, %v512_v25  ;;  %v668_v32 = vpop.f32.mrb[14].mxu0  ;;  %878 = vmatprep.subr.bf16.mxu1 %v710_v26 }
 0x14f   : > { %v669_v33 = vadd.f32 %v668_v32, %v517_v30  ;;  %v670_v34 = vpop.f32.mrb[15].mxu0  ;;  %879 = vmatpush1.bf16.msra.mxu1 %v709_v24  ;;  %v685_v36 = vmax.f32 %v665_v28, 0.0 }
 0x150   : > { %v671_v35 = vadd.f32 %v670_v34, %v517_v30  ;;  %v686_v1 = vmax.f32 %v667_v31, 0.0  ;;  %v762_v34 = vpop.permute.xlu0 %761 }
 0x151   : > { %v687_v37 = vmax.f32 %v669_v33, 0.0 }
 0x152   : > { %v688_v38 = vmax.f32 %v671_v35, 0.0 }
 0x153   : > { %v711_v39 = vpack.c.bf16 %v687_v37, %v685_v36 }
 0x154   : > { %v712_v40 = vpack.c.bf16 %v688_v38, %v686_v1  ;;  %v767_v38 = vpop.permute.xlu1 %766 }
 0x156   : > { %880 = vmatprep.subr.bf16.mxu1 %v712_v40 }
 0x157   : > { %881 = vmatpush1.bf16.msra.mxu1 %v711_v39 }
 0x15a   : > { %1506 = vmatmul.mubr.msk.bf16.vlgmr.msra.gmra.mrb[0].mxu1 %vm849_vm1, %v1608_v41 }
 0x15b   : > { %916 = vmatprep.mubr.bf16.mxu1 %v1686_v3 }
 0x162   : > { %1507 = vmatmul.mubr.msk.bf16.gmra.mrb[4].mxu1 %vm849_vm1, %v1609_v42 }
 0x163   : > { %926 = vmatprep.mubr.bf16.mxu1 %v1686_v3 }
 0x16a   : > { %1508 = vmatmul.mubr.msk.bf16.gmra.mrb[8].mxu1 %vm849_vm1, %v1610_v43 }
 0x16b   : > { %936 = vmatprep.mubr.bf16.mxu1 %v1686_v3 }
 0x172   : > { %1509 = vmatmul.mubr.msk.bf16.gmra.mrb[12].mxu1 %vm849_vm1, %v1611_v44 }
 0x173   : > { %946 = vmatprep.mubr.bf16.mxu1 %v1686_v3 }
 0x17a   : > { %1510 = vmatmul.mubr.msk.bf16.gmra.mrb[16].mxu1 %vm849_vm1, %v1612_v45 }
 0x17b   : > { %956 = vmatprep.mubr.bf16.mxu1 %v1686_v3 }
 0x182   : > { %1511 = vmatmul.mubr.msk.bf16.gmra.mrb[20].mxu1 %vm849_vm1, %v1613_v46 }
 0x183   : > { %966 = vmatprep.mubr.bf16.mxu1 %v1686_v3 }
 0x18a   : > { %1512 = vmatmul.mubr.msk.bf16.gmra.mrb[24].mxu1 %vm849_vm1, %v1614_v47 }
 0x18b   : > { %976 = vmatprep.mubr.bf16.mxu1 %v1686_v3 }
 0x192   : > { %1513 = vmatmul.mubr.msk.bf16.gmra.mrb[28].mxu1 %vm849_vm1, %v1615_v48 }
 0x193   : > { %1147 = vmatprep.mubr.bf16.mxu1 %v1686_v3 }
 0x22d   : > { %v908_v50 = vpop.f32.mrb[0].mxu1 }
 0x22e   : > { %v909_v51 = vadd.f32 %v908_v50, %v732_v49  ;;  %v910_v52 = vpop.f32.mrb[1].mxu1 }
 0x22f   : > { %v911_v54 = vadd.f32 %v910_v52, %v732_v49  ;;  %v912_v55 = vpop.f32.mrb[2].mxu1  ;;  %v772_v49 = vpop.permute.xlu0 %771 }
 0x230   : > { %v913_v56 = vadd.f32 %v912_v55, %v737_v53  ;;  %v914_v57 = vpop.f32.mrb[3].mxu1  ;;  %v987_v59 = vmax.f32 %v909_v51, 0.0 }
 0x231   : > { %v915_v58 = vadd.f32 %v914_v57, %v737_v53  ;;  %v988_v61 = vmax.f32 %v911_v54, 0.0  ;;  %v777_v54 = vpop.permute.xlu1 %776 }
 0x232   : > { %v989_v60 = vmax.f32 %v913_v56, 0.0 }
 0x233   : > { %v990_v62 = vmax.f32 %v915_v58, 0.0 }
 0x234   : > { %v1027_v63 = vpack.c.bf16 %v989_v60, %v987_v59 }
 0x235   : > { %v1028_v2 = vpack.c.bf16 %v990_v62, %v988_v61  ;;  %v918_v4 = vpop.f32.mrb[4].mxu1 }
 0x236   : > { %v919_v5 = vadd.f32 %v918_v4, %v742_v0  ;;  %v920_v6 = vpop.f32.mrb[5].mxu1 }
 0x237   : > { %v921_v8 = vadd.f32 %v920_v6, %v742_v0  ;;  %v922_v9 = vpop.f32.mrb[6].mxu1  ;;  %1115 = vmatprep.subr.bf16.mxu1 %v1028_v2  ;;  %v782_v2 = vpop.permute.xlu0 %781 }
 0x238   : > { %v923_v10 = vadd.f32 %v922_v9, %v747_v7  ;;  %v924_v11 = vpop.f32.mrb[7].mxu1  ;;  %1116 = vmatpush1.bf16.msra.mxu1 %v1027_v63  ;;  %v991_v13 = vmax.f32 %v919_v5, 0.0 }
 0x239   : > { %v925_v12 = vadd.f32 %v924_v11, %v747_v7  ;;  %v992_v15 = vmax.f32 %v921_v8, 0.0  ;;  %v787_v8 = vpop.permute.xlu1 %786 }
 0x23a   : > { %v993_v14 = vmax.f32 %v923_v10, 0.0 }
 0x23b   : > { %v994_v16 = vmax.f32 %v925_v12, 0.0 }
 0x23c   : > { %v1029_v17 = vpack.c.bf16 %v993_v14, %v991_v13 }
 0x23d   : > { %v1030_v19 = vpack.c.bf16 %v994_v16, %v992_v15  ;;  %v928_v20 = vpop.f32.mrb[8].mxu1 }
 0x23e   : > { %v929_v21 = vadd.f32 %v928_v20, %v752_v18  ;;  %v930_v22 = vpop.f32.mrb[9].mxu1 }
 0x23f   : > { %v931_v24 = vadd.f32 %v930_v22, %v752_v18  ;;  %v932_v25 = vpop.f32.mrb[10].mxu1  ;;  %1117 = vmatprep.subr.bf16.mxu1 %v1030_v19  ;;  %v792_v19 = vpop.permute.xlu0 %791 }
 0x240   : > { %v933_v26 = vadd.f32 %v932_v25, %v757_v23  ;;  %v934_v27 = vpop.f32.mrb[11].mxu1  ;;  %1118 = vmatpush1.bf16.msra.mxu1 %v1029_v17  ;;  %v995_v29 = vmax.f32 %v929_v21, 0.0 }
 0x241   : > { %v935_v28 = vadd.f32 %v934_v27, %v757_v23  ;;  %v996_v31 = vmax.f32 %v931_v24, 0.0  ;;  %v797_v24 = vpop.permute.xlu1 %796 }
 0x242   : > { %v997_v30 = vmax.f32 %v933_v26, 0.0 }
 0x243   : > { %v998_v32 = vmax.f32 %v935_v28, 0.0 }
 0x244   : > { %v1031_v33 = vpack.c.bf16 %v997_v30, %v995_v29 }
 0x245   : > { %v1032_v35 = vpack.c.bf16 %v998_v32, %v996_v31  ;;  %v938_v36 = vpop.f32.mrb[12].mxu1 }
 0x246   : > { %v939_v37 = vadd.f32 %v938_v36, %v762_v34  ;;  %v940_v1 = vpop.f32.mrb[13].mxu1 }
 0x247   : > { %v941_v39 = vadd.f32 %v940_v1, %v762_v34  ;;  %v942_v40 = vpop.f32.mrb[14].mxu1  ;;  %1119 = vmatprep.subr.bf16.mxu1 %v1032_v35  ;;  %v802_v35 = vpop.permute.xlu0 %801 }
 0x248   : > { %v943_v41 = vadd.f32 %v942_v40, %v767_v38  ;;  %v944_v42 = vpop.f32.mrb[15].mxu1  ;;  %1120 = vmatpush1.bf16.msra.mxu1 %v1031_v33  ;;  %v999_v44 = vmax.f32 %v939_v37, 0.0 }
 0x249   : > { %v945_v43 = vadd.f32 %v944_v42, %v767_v38  ;;  %v1000_v46 = vmax.f32 %v941_v39, 0.0  ;;  %v807_v39 = vpop.permute.xlu1 %806 }
 0x24a   : > { %v1001_v45 = vmax.f32 %v943_v41, 0.0 }
 0x24b   : > { %v1002_v47 = vmax.f32 %v945_v43, 0.0 }
 0x24c   : > { %v1033_v48 = vpack.c.bf16 %v1001_v45, %v999_v44 }
 0x24d   : > { %v1034_v50 = vpack.c.bf16 %v1002_v47, %v1000_v46  ;;  %v948_v51 = vpop.f32.mrb[16].mxu1 }
 0x24e   : > { %v949_v52 = vadd.f32 %v948_v51, %v772_v49  ;;  %v950_v53 = vpop.f32.mrb[17].mxu1  ;;  %v1616_v51 = vld [vmem:[%s2134_s5] sm:$0xff]  }
 0x24f   : > { %v951_v55 = vadd.f32 %v950_v53, %v772_v49  ;;  %v952_v56 = vpop.f32.mrb[18].mxu1  ;;  %1121 = vmatprep.subr.bf16.mxu1 %v1034_v50  ;;  %v1618_v53 = vld [vmem:[%s2134_s5 + $0x10] sm:$0xff]  }
 0x250   : > { %v953_v57 = vadd.f32 %v952_v56, %v777_v54  ;;  %v954_v58 = vpop.f32.mrb[19].mxu1  ;;  %1122 = vmatpush1.bf16.msra.mxu1 %v1033_v48  ;;  %v1003_v60 = vmax.f32 %v949_v52, 0.0  ;;  %v1617_v52 = vld [vmem:[%s2134_s5 + $0x8] sm:$0xff]  }
 0x251   : > { %v955_v59 = vadd.f32 %v954_v58, %v777_v54  ;;  %v1004_v62 = vmax.f32 %v951_v55, 0.0  ;;  %v1619_v54 = vld [vmem:[%s2134_s5 + $0x18] sm:$0xff]   ;;  %v1054_v55 = vpop.permute.xlu0 %1053 }
 0x252   : > { %v1005_v61 = vmax.f32 %v953_v57, 0.0 }
 0x253   : > { %v1006_v63 = vmax.f32 %v955_v59, 0.0  ;;  %v1059_v59 = vpop.permute.xlu1 %1058 }
 0x254   : > { %v1035_v0 = vpack.c.bf16 %v1005_v61, %v1003_v60 }
 0x255   : > { %v1036_v4 = vpack.c.bf16 %v1006_v63, %v1004_v62  ;;  %v958_v5 = vpop.f32.mrb[20].mxu1 }
 0x256   : > { %v959_v6 = vadd.f32 %v958_v5, %v782_v2  ;;  %v960_v7 = vpop.f32.mrb[21].mxu1 }
 0x257   : > { %v961_v9 = vadd.f32 %v960_v7, %v782_v2  ;;  %v962_v10 = vpop.f32.mrb[22].mxu1  ;;  %1123 = vmatprep.subr.bf16.mxu1 %v1036_v4 }
 0x258   : > { %v963_v11 = vadd.f32 %v962_v10, %v787_v8  ;;  %v964_v12 = vpop.f32.mrb[23].mxu1  ;;  %1124 = vmatpush1.bf16.msra.mxu1 %v1035_v0  ;;  %v1007_v14 = vmax.f32 %v959_v6, 0.0 }
 0x259   : > { %v965_v13 = vadd.f32 %v964_v12, %v787_v8  ;;  %v1008_v16 = vmax.f32 %v961_v9, 0.0  ;;  %v1064_v8 = vpop.permute.xlu0 %1063 }
 0x25a   : > { %v1009_v15 = vmax.f32 %v963_v11, 0.0 }
 0x25b   : > { %v1010_v17 = vmax.f32 %v965_v13, 0.0  ;;  %v1069_v13 = vpop.permute.xlu1 %1068 }
 0x25c   : > { %v1037_v18 = vpack.c.bf16 %v1009_v15, %v1007_v14 }
 0x25d   : > { %v1038_v20 = vpack.c.bf16 %v1010_v17, %v1008_v16  ;;  %v968_v21 = vpop.f32.mrb[24].mxu1 }
 0x25e   : > { %v969_v22 = vadd.f32 %v968_v21, %v792_v19  ;;  %v970_v23 = vpop.f32.mrb[25].mxu1 }
 0x25f   : > { %v971_v25 = vadd.f32 %v970_v23, %v792_v19  ;;  %v972_v26 = vpop.f32.mrb[26].mxu1  ;;  %1125 = vmatprep.subr.bf16.mxu1 %v1038_v20 }
 0x260   : > { %v973_v27 = vadd.f32 %v972_v26, %v797_v24  ;;  %v974_v28 = vpop.f32.mrb[27].mxu1  ;;  %1126 = vmatpush1.bf16.msra.mxu1 %v1037_v18  ;;  %v1011_v30 = vmax.f32 %v969_v22, 0.0 }
 0x261   : > { %v975_v29 = vadd.f32 %v974_v28, %v797_v24  ;;  %v1012_v32 = vmax.f32 %v971_v25, 0.0  ;;  %v1074_v24 = vpop.permute.xlu0 %1073 }
 0x262   : > { %v1013_v31 = vmax.f32 %v973_v27, 0.0 }
 0x263   : > { %v1014_v33 = vmax.f32 %v975_v29, 0.0  ;;  %v1079_v29 = vpop.permute.xlu1 %1078 }
 0x264   : > { %v1039_v34 = vpack.c.bf16 %v1013_v31, %v1011_v30 }
 0x265   : > { %v1040_v36 = vpack.c.bf16 %v1014_v33, %v1012_v32  ;;  %v978_v37 = vpop.f32.mrb[28].mxu1 }
 0x266   : > { %v979_v1 = vadd.f32 %v978_v37, %v802_v35  ;;  %v980_v38 = vpop.f32.mrb[29].mxu1 }
 0x267   : > { %v981_v40 = vadd.f32 %v980_v38, %v802_v35  ;;  %v982_v41 = vpop.f32.mrb[30].mxu1  ;;  %1127 = vmatprep.subr.bf16.mxu1 %v1040_v36 }
 0x268   : > { %v983_v42 = vadd.f32 %v982_v41, %v807_v39  ;;  %v984_v43 = vpop.f32.mrb[31].mxu1  ;;  %1128 = vmatpush1.bf16.msra.mxu1 %v1039_v34  ;;  %v1015_v45 = vmax.f32 %v979_v1, 0.0 }
 0x269   : > { %v985_v44 = vadd.f32 %v984_v43, %v807_v39  ;;  %v1016_v47 = vmax.f32 %v981_v40, 0.0  ;;  %v1084_v39 = vpop.permute.xlu0 %1083 }
 0x26a   : > { %v1017_v46 = vmax.f32 %v983_v42, 0.0 }
 0x26b   : > { %v1018_v48 = vmax.f32 %v985_v44, 0.0  ;;  %v1089_v44 = vpop.permute.xlu1 %1088 }
 0x26c   : > { %v1041_v49 = vpack.c.bf16 %v1017_v46, %v1015_v45 }
 0x26d   : > { %v1042_v50 = vpack.c.bf16 %v1018_v48, %v1016_v47 }
 0x26f   : > { %1129 = vmatprep.subr.bf16.mxu1 %v1042_v50 }
 0x270   : > { %1130 = vmatpush1.bf16.msra.mxu1 %v1041_v49 }
 0x273   : > { %1148 = vmatmul.mubr.bf16.vlgmr.msra.gmra.mrb[32].mxu1 %v1616_v51 }
 0x274   : > { %1157 = vmatprep.mubr.bf16.mxu1 %v1686_v3 }
 0x27b   : > { %1158 = vmatmul.mubr.bf16.gmra.mrb[36].mxu1 %v1617_v52 }
 0x27c   : > { %1167 = vmatprep.mubr.bf16.mxu1 %v1686_v3 }
 0x283   : > { %1168 = vmatmul.mubr.bf16.gmra.mrb[40].mxu1 %v1618_v53 }
 0x284   : > { %1177 = vmatprep.mubr.bf16.mxu1 %v1686_v3 }
 0x28b   : > { %1178 = vmatmul.mubr.bf16.gmra.mrb[44].mxu1 %v1619_v54 }
 0x346   : > { %v1149_v56 = vpop.f32.mrb[32].mxu1 }
 0x347   : > { %v1150_v57 = vadd.f32 %v1149_v56, %v1054_v55  ;;  %v1151_v58 = vpop.f32.mrb[33].mxu1  ;;  %v1620_v56 = vld [vmem:[%s2136_s7] sm:$0xff]  }
 0x348   : > { %v1152_v60 = vadd.f32 %v1151_v58, %v1054_v55  ;;  %v1153_v61 = vpop.f32.mrb[34].mxu1  ;;  %v1223_v58 = vpop.permute.xlu0 %1222 }
 0x349   : > { %v1154_v62 = vadd.f32 %v1153_v61, %v1059_v59  ;;  %v1155_v63 = vpop.f32.mrb[35].mxu1  ;;  %v1188_v2 = vmax.f32 %v1150_v57, 0.0  ;;  %v1621_v57 = vld [vmem:[%s2136_s7 + $0x8] sm:$0xff]  }
 0x34a   : > { %v1156_v0 = vadd.f32 %v1155_v63, %v1059_v59  ;;  %v1189_v5 = vmax.f32 %v1152_v60, 0.0  ;;  %v1228_v59 = vpop.permute.xlu1 %1227 }
 0x34b   : > { %v1190_v4 = vmax.f32 %v1154_v62, 0.0 }
 0x34c   : > { %v1191_v6 = vmax.f32 %v1156_v0, 0.0  ;;  %v1233_v60 = vpop.permute.xlu0 %1232 }
 0x34d   : > { %v1208_v7 = vpack.c.bf16 %v1190_v4, %v1188_v2 }
 0x34e   : > { %v1209_v9 = vpack.c.bf16 %v1191_v6, %v1189_v5  ;;  %v1159_v10 = vpop.f32.mrb[36].mxu1  ;;  %v1238_v61 = vpop.permute.xlu1 %1237 }
 0x34f   : > { %v1160_v11 = vadd.f32 %v1159_v10, %v1064_v8  ;;  %v1161_v12 = vpop.f32.mrb[37].mxu1 }
 0x350   : > { %v1162_v14 = vadd.f32 %v1161_v12, %v1064_v8  ;;  %v1163_v15 = vpop.f32.mrb[38].mxu1  ;;  %1256 = vmatprep.subr.bf16.mxu0 %v1209_v9  ;;  %v1324_v10 = vpop.permute.xlu0 %1323 }
 0x351   : > { %v1164_v16 = vadd.f32 %v1163_v15, %v1069_v13  ;;  %v1165_v17 = vpop.f32.mrb[39].mxu1  ;;  %1257 = vmatpush1.bf16.msra.mxu0 %v1208_v7  ;;  %v1192_v19 = vmax.f32 %v1160_v11, 0.0 }
 0x352   : > { %v1166_v18 = vadd.f32 %v1165_v17, %v1069_v13  ;;  %v1193_v21 = vmax.f32 %v1162_v14, 0.0  ;;  %v1329_v11 = vpop.permute.xlu1 %1328 }
 0x353   : > { %v1194_v20 = vmax.f32 %v1164_v16, 0.0 }
 0x354   : > { %v1195_v22 = vmax.f32 %v1166_v18, 0.0 }
 0x355   : > { %v1210_v23 = vpack.c.bf16 %v1194_v20, %v1192_v19 }
 0x356   : > { %v1211_v25 = vpack.c.bf16 %v1195_v22, %v1193_v21  ;;  %v1169_v26 = vpop.f32.mrb[40].mxu1 }
 0x357   : > { %v1170_v27 = vadd.f32 %v1169_v26, %v1074_v24  ;;  %v1171_v28 = vpop.f32.mrb[41].mxu1 }
 0x358   : > { %v1172_v30 = vadd.f32 %v1171_v28, %v1074_v24  ;;  %v1173_v31 = vpop.f32.mrb[42].mxu1  ;;  %1258 = vmatprep.subr.bf16.mxu0 %v1211_v25 }
 0x359   : > { %v1174_v32 = vadd.f32 %v1173_v31, %v1079_v29  ;;  %v1175_v33 = vpop.f32.mrb[43].mxu1  ;;  %1259 = vmatpush1.bf16.msra.mxu0 %v1210_v23  ;;  %v1196_v35 = vmax.f32 %v1170_v27, 0.0  ;;  %v1334_v27 = vpop.permute.xlu0 %1333 }
 0x35a   : > { %v1176_v34 = vadd.f32 %v1175_v33, %v1079_v29  ;;  %v1197_v37 = vmax.f32 %v1172_v30, 0.0 }
 0x35b   : > { %v1198_v36 = vmax.f32 %v1174_v32, 0.0  ;;  %v1339_v32 = vpop.permute.xlu1 %1338 }
 0x35c   : > { %v1199_v1 = vmax.f32 %v1176_v34, 0.0 }
 0x35d   : > { %v1212_v38 = vpack.c.bf16 %v1198_v36, %v1196_v35 }
 0x35e   : > { %v1213_v40 = vpack.c.bf16 %v1199_v1, %v1197_v37  ;;  %v1179_v41 = vpop.f32.mrb[44].mxu1 }
 0x35f   : > { %v1180_v42 = vadd.f32 %v1179_v41, %v1084_v39  ;;  %v1181_v43 = vpop.f32.mrb[45].mxu1 }
 0x360   : > { %v1182_v45 = vadd.f32 %v1181_v43, %v1084_v39  ;;  %v1183_v46 = vpop.f32.mrb[46].mxu1  ;;  %1260 = vmatprep.subr.bf16.mxu0 %v1213_v40 }
 0x361   : > { %v1184_v47 = vadd.f32 %v1183_v46, %v1089_v44  ;;  %v1185_v48 = vpop.f32.mrb[47].mxu1  ;;  %1261 = vmatpush1.bf16.msra.mxu0 %v1212_v38  ;;  %v1200_v50 = vmax.f32 %v1180_v42, 0.0  ;;  %v1373_v38 = vlaneseq }
 0x362   : > { %v1186_v49 = vadd.f32 %v1185_v48, %v1089_v44  ;;  %v1201_v52 = vmax.f32 %v1182_v45, 0.0 }
 0x363   : > { %v1202_v51 = vmax.f32 %v1184_v47, 0.0  ;;  %v1374_v43 = vshrl.u32 %v1373_v38, 7  ;;  %vm1401_vm2 = vcmp.lt.s32.totalorder %v1373_v38, 256 }
 0x364   : > { %v1203_v53 = vmax.f32 %v1186_v49, 0.0 }
 0x365   : > { %v1214_v54 = vpack.c.bf16 %v1202_v51, %v1200_v50  ;;  %v1375_v48 = vsub.s32 0, %v1374_v43  ;;  %v1687_v50 = vmov 1966171168  }
 0x366   : > { %v1215_v55 = vpack.c.bf16 %v1203_v53, %v1201_v52  ;;  %v1385_v51 = vunpack.c.l.s4 %v1687_v50  ;;  %v1371_v52 = vpop.permute.xlu0 %1370 }
 0x368   : > { %1262 = vmatprep.subr.bf16.mxu0 %v1215_v55 }
 0x369   : > { %1263 = vmatpush1.bf16.msra.mxu0 %v1214_v54 }
 0x36c   : > { %1520 = vmatmul.mubr.msk.bf16.vlgmr.msra.gmra.mrb[16].mxu0 %vm849_vm1, %v1620_v56  ;;  %v1376_v56 = vrot.slane %v1371_v52, %v1375_v48 }
 0x36d   : > { %1298 = vmatprep.mubr.bf16.mxu0 %v1686_v3 }
 0x374   : > { %1521 = vmatmul.mubr.msk.bf16.gmra.mrb[20].mxu0 %vm849_vm1, %v1621_v57 }
 0x43f   : > { %v1290_v62 = vpop.f32.mrb[16].mxu0 }
 0x440   : > { %v1291_v63 = vadd.f32 %v1290_v62, %v1223_v58  ;;  %v1292_v0 = vpop.f32.mrb[17].mxu0 }
 0x441   : > { %v1293_v2 = vadd.f32 %v1292_v0, %v1223_v58  ;;  %v1294_v4 = vpop.f32.mrb[18].mxu0  ;;  %v1386_v58 = vunpack.c.0.s8 %v1385_v51 }
 0x442   : > { %v1309_v5 = vmax.f32 %v1291_v63, 0.0  ;;  %v1295_v6 = vadd.f32 %v1294_v4, %v1228_v59  ;;  %v1296_v7 = vpop.f32.mrb[19].mxu0 }
 0x443   : > { %v1310_v3 = vmax.f32 %v1293_v2, 0.0  ;;  %v1297_v8 = vadd.f32 %v1296_v7, %v1228_v59  ;;  %v1389_v63 = vsub.s32 %v1386_v58, %v1374_v43 }
 0x444   : > { %v1311_v9 = vmax.f32 %v1295_v6, 0.0  ;;  %v1341_v13 = vmul.f32 %v1324_v10, %v1309_v5 }
 0x445   : > { %v1312_v12 = vmax.f32 %v1297_v8, 0.0  ;;  %v1342_v15 = vmul.f32 %v1324_v10, %v1310_v3 }
 0x446   : > { %v1343_v14 = vmul.f32 %v1329_v11, %v1311_v9 }
 0x447   : > { %v1344_v16 = vmul.f32 %v1329_v11, %v1312_v12  ;;  %v1300_v17 = vpop.f32.mrb[20].mxu0 }
 0x448   : > { %v1349_v18 = vadd.f32 %v1343_v14, %v1341_v13  ;;  %v1301_v19 = vadd.f32 %v1300_v17, %v1233_v60  ;;  %v1302_v20 = vpop.f32.mrb[21].mxu0 }
 0x449   : > { %v1358_v21 = vadd.f32 %v1344_v16, %v1342_v15  ;;  %v1303_v22 = vadd.f32 %v1302_v20, %v1233_v60  ;;  %v1304_v23 = vpop.f32.mrb[22].mxu0 }
 0x44a   : > { %v1313_v24 = vmax.f32 %v1301_v19, 0.0  ;;  %v1305_v25 = vadd.f32 %v1304_v23, %v1238_v61  ;;  %v1306_v26 = vpop.f32.mrb[23].mxu0 }
 0x44b   : > { %v1314_v28 = vmax.f32 %v1303_v22, 0.0  ;;  %v1307_v29 = vadd.f32 %v1306_v26, %v1238_v61 }
 0x44c   : > { %v1345_v30 = vmul.f32 %v1334_v27, %v1313_v24  ;;  %v1315_v31 = vmax.f32 %v1305_v25, 0.0 }
 0x44d   : > { %v1346_v33 = vmul.f32 %v1334_v27, %v1314_v28  ;;  %v1316_v34 = vmax.f32 %v1307_v29, 0.0 }
 0x44e   : > { %v1350_v35 = vadd.f32 %v1349_v18, %v1345_v30  ;;  %v1347_v36 = vmul.f32 %v1339_v32, %v1315_v31 }
 0x44f   : > { %v1359_v37 = vadd.f32 %v1358_v21, %v1346_v33  ;;  %v1348_v1 = vmul.f32 %v1339_v32, %v1316_v34 }
 0x450   : > { %v1351_v39 = vadd.f32 %v1350_v35, %v1347_v36 }
 0x451   : > { %v1360_v40 = vadd.f32 %v1359_v37, %v1348_v1 }
 0x452   : > { %v1352_v41 = vrot.slane %v1351_v39, 4 }
 0x453   : > { %v1361_v42 = vrot.slane %v1360_v40, 4 }
 0x454   : > { %v1353_v44 = vadd.f32 %v1352_v41, %v1351_v39 }
 0x455   : > { %v1362_v45 = vadd.f32 %v1361_v42, %v1360_v40 }
 0x456   : > { %v1354_v46 = vrot.slane %v1353_v44, 2 }
 0x457   : > { %v1363_v47 = vrot.slane %v1362_v45, 2 }
 0x458   : > { %v1355_v49 = vadd.f32 %v1354_v46, %v1353_v44 }
 0x459   : > { %v1364_v53 = vadd.f32 %v1363_v47, %v1362_v45 }
 0x45a   : > { %v1356_v54 = vrot.slane %v1355_v49, 1 }
 0x45b   : > { %v1365_v55 = vrot.slane %v1364_v53, 1 }
 0x45c   : > { %v1357_v57 = vadd.f32 %v1356_v54, %v1355_v49 }
 0x45d   : > { %v1366_v59 = vadd.f32 %v1365_v55, %v1364_v53 }
 0x45e   : > { %v1377_v60 = vadd.f32 %v1376_v56, %v1357_v57 }
 0x45f   : > { %v1378_v61 = vadd.f32 %v1376_v56, %v1366_v59 }
 0x460   : > { %v1379_v62 = vmax.f32 %v1377_v60, 0.0 }
 0x461   : > { %v1380_v0 = vmax.f32 %v1378_v61, 0.0 }
 0x463   : > { %v1383_v2 = vcombine.low %v1379_v62, %v1380_v0  ;;  %1411 = sbr.rel (!%p1790_p5) target bundleno = 1157 (0x485), region = 68 }
 0x465   : > { %v1390_v4 = vrot.slane %v1383_v2, %v1389_v63 }
 0x467   : > { %v1397_v5 = vrot.slane %v1390_v4, %v1389_v63 }
 0x469   : > { %1403 = vst.msk [vmem:[%s394_s18] sm:$0x3] %vm1401_vm2, %v1397_v5 }
 0x46a   : > { %s2150_s14 = smov (!%p1414_p11, %s1413_s14), 2 }
 0x46b   : > { %s2080_s26 = sshll.u32 %s2150_s14, 4 }
 0x46c   : > { %s1418_s12 = ssub.s32 32, %s2080_s26 }
 0x46d   : > { %1419 = vsyncadd %s2075_s23, %s1418_s12  ;;  %p1525_p12 = scmp.ne.s32.totalorder %s2080_s26, 0  ;;  %s2089_s28 = scalar_lea.hbm %s2140_s11, %s1801_s30 }
 0x46e   : > { %s1424_s27 = sshll.u32 %s394_s18, 4  ;;  %s1688_s16 = smov [#allocation3]   ;;  %s1425_s27 = int_to_ptr.vmem [resolvable:$true] %s1424_s27 }
 0x46f   : > { %s1622_s10 = scalar_lea.vmem %s1425_s27, %s2080_s26  ;;  %s1626_s17 = sshll.u32 %s1688_s16, 4  ;;  %s1627_s17 = int_to_ptr.vmem [resolvable:$false] %s1626_s17 }
 0x470   : > { %p1623_p13 = scmp.ne.s32.totalorder %s1425_s27, %s1622_s10  ;;  %s1628_s25 = scalar_lea.vmem %s1627_s17, 64 }
 0x471   : > { %p1629_p2 = scmp.lt.s32.totalorder %s1425_s27, %s1627_s17  ;;  %p1630_p3 = scmp.lt.s32.totalorder %s1628_s25, %s1622_s10 }
 0x472   : > { %p1624_p0 = pnand %p1623_p13, %p1525_p12 }
 0x473   : > { %p1631_p4 = por %p1630_p3, %p1629_p2 }
 0x474   : > { %p1625_p1 = pneg %p1624_p0 }
 0x476   : > { %p1632_p5 = pnand %p1631_p4, %p1625_p1 }
 0x478   : > { %1635 = shalt.err (!%p1632_p5)
}
 0x479   : > { %s1636_s30 = scalar_lea.hbm %s2089_s28, %s2080_s26  ;;  %s1640_s12 = scalar_lea.hbm %s2140_s11, 48 }
 0x47a   : > { %p1637_p7 = scmp.ne.s32.totalorder %s2089_s28, %s1636_s30  ;;  %p1641_p10 = scmp.lt.u32.totalorder %s2089_s28, %s2140_s11 }
 0x47b   : > { %p1642_p11 = scmp.lt.u32.totalorder %s1640_s12, %s1636_s30  ;;  %p1644_p0 = scmp.lt.u32.totalorder %s1636_s30, %s2089_s28 }
 0x47c   : > { %p1638_p8 = pnand %p1637_p7, %p1525_p12 }
 0x47d   : > { %p1643_p13 = por %p1642_p11, %p1641_p10 }
 0x47e   : > { %p1639_p9 = pneg %p1638_p8 }
 0x47f   : > { %p1645_p1 = por %p1644_p0, %p1643_p13 }
 0x481   : > { %p1646_p2 = pnand %p1645_p1, %p1639_p9 }
 0x483   : > { %1649 = shalt.err (!%p1646_p2)
}
 0x484   : > { %1427 = dma.vmem_to_hbm [thread:$0]  (%p1525_p12), %s1425_s27, %s2080_s26, %s2089_s28, %s2075_s23  }
 0x485 PF: > { %p1567_p3 = scmp.ge.s32.totalorder %s1684_s22, 2  ;;  %s1436_s10 = sand.u32 1, %s1672_s19  }
 0x486   : > { %s1437_s16 = scalar_lea.sflag [#allocation4], %s1436_s10 }
 0x487   : > { %p1564_p4 = pnand %p1567_p3, %p1794_p6 }
 0x489   : > { %1667 = dma.done.wait (!%p1564_p4), %s1437_s16, 32  }
 0x48a   : > { %1669 = vsyncadd (!%p1564_p4), %s1437_s16, 4294967264  ;;  %s2144_s17 = sld [smem:[#allocation6_spill]]  ;;  %p23_p5 = scmp.ge.s32.totalorder %s1777_s24, 4  }
 0x48b   : > { %s2145_s19 = smov %s1676_s20  ;;  %s2146_s20 = smov %s1680_s21 }
 0x48c   : > { %s2148_s22 = smov %s1777_s24  ;;  %25 = sbr.rel (!%p23_p5) target bundleno = 6 (0x6), region = 99 }
 0x490   : > { %s2147_s21 = smov %s2144_s17 }
 0x493   :  { %1442 = vsyncpa [#allocation4], 1 }
 0x494   :  { %1444 = vsyncpa [#allocation4 + $0x1], 1 }

</bundles_post_ra>
